<compile_context>
chip_gen: v5e
topology: v5e:2x2
jax: 0.10.0
libtpu: 0.0.40
codegen_flags: <defaults>
</compile_context>

<pallas_src>
import jax
import jax.numpy as jnp
from jax.experimental import pallas as pl
from jax.experimental.pallas import tpu as pltpu

# ---- model hyper-parameters ----
SEQ_LEN = 8
AA_VAR = 4
ZDIM = 16
ALPHA = 0.1            # LeakyReLU negative slope
Q = SEQ_LEN * AA_VAR   # 32
HSIZE = int(1.5 * Q)   # 48
BN_EPS = 1e-5

BATCH = 16
# One batch tile at this size.  At scale: pick BM as a multiple of 128 (v5e)
# or 256 (v6e/v7x) and keep >=2 parallel tiles on v7x (2 TensorCores).
BM = BATCH

# Row offsets inside the packed weight slab:
#   [ W1 (16x48) | W2' (48x48) | W3 (48x48) | W4' (48x48, col-padded) | G (32x48, col-padded) ]
_R1 = ZDIM            # 16
_R2 = _R1 + HSIZE     # 64
_R3 = _R2 + HSIZE     # 112
_R4 = _R3 + HSIZE     # 160
_R5 = _R4 + Q         # 192


def _leaky_relu(x, alpha):
    return jnp.where(x > 0, x, alpha * x)


def decoder_kernel(z_ref, w_ref, b_ref, out_ref):
    """Whole decoder (BN folded into Linears) + grouped softmax for one batch tile.

    z_ref:   (BM, ZDIM)
    w_ref:   (192, 48)  packed weight slab (see offsets above)
    b_ref:   (4, 48)    packed biases [b1; b2'; b3; b4'(col-padded)]
    out_ref: (BM, Q)    lane-dense softmax probabilities (reshaped to 3D outside)
    """
    x = z_ref[...]                                                        # (BM, 16)

    # Linear(zdim -> hsize) + LeakyReLU   (BN1 folded into the next Linear)
    h = jnp.dot(x, w_ref[0:_R1, :], preferred_element_type=jnp.float32) + b_ref[0:1, :]
    h = _leaky_relu(h, ALPHA)

    # Linear(hsize -> hsize) [BN1 folded] + LeakyReLU
    h = jnp.dot(h, w_ref[_R1:_R2, :], preferred_element_type=jnp.float32) + b_ref[1:2, :]
    h = _leaky_relu(h, ALPHA)
    # Dropout(p=0.3): identity in eval mode.

    # Linear(hsize -> hsize) + LeakyReLU
    h = jnp.dot(h, w_ref[_R2:_R3, :], preferred_element_type=jnp.float32) + b_ref[2:3, :]
    h = _leaky_relu(h, ALPHA)

    # Final Linear(hsize -> q) [BN2 folded]; padded columns Q:HSIZE are zero.
    logits = (jnp.dot(h, w_ref[_R3:_R4, :], preferred_element_type=jnp.float32)
              + b_ref[3:4, :])[:, :Q]                                     # (BM, 32)

    # Grouped softmax over AA_VAR: per-group max via a tiny 3D view, exp, then
    # grouped sums via a block-diagonal ones matmul on the (otherwise idle) MXU.
    bm = logits.shape[0]
    logits3 = logits.reshape(bm, SEQ_LEN, AA_VAR)
    m3 = jnp.max(logits3, axis=2, keepdims=True)                          # (BM, 8, 1)
    e = jnp.exp(logits3 - m3).reshape(bm, Q)                              # (BM, 32)
    g = w_ref[_R4:_R5, :]                                                 # (32, 48)
    denom = jnp.dot(e, g, preferred_element_type=jnp.float32)[:, :Q]      # (BM, 32)
    out_ref[...] = e / denom


def decoder_forward(z, w_slab, b_slab):
    B = z.shape[0]
    assert B % BM == 0
    grid = (B // BM,)

    out2d = pl.pallas_call(
        decoder_kernel,
        out_shape=jax.ShapeDtypeStruct((B, Q), jnp.float32),
        grid=grid,
        in_specs=[
            pl.BlockSpec((BM, ZDIM), lambda i: (i, 0)),
            pl.BlockSpec((_R5, HSIZE), lambda i: (0, 0)),
            pl.BlockSpec((4, HSIZE), lambda i: (0, 0)),
        ],
        out_specs=pl.BlockSpec((BM, Q), lambda i: (i, 0)),
        compiler_params=pltpu.CompilerParams(
            dimension_semantics=("parallel",)),
    )(z, w_slab, b_slab)

    # Layout plumbing only: (B, 32) -> (B, seq_len, aa_var), matches torch .view
    return out2d.reshape(B, SEQ_LEN, AA_VAR)


# ---------------- parameter construction / packing ----------------

def init_params(key):
    """Deterministic synthetic parameters (shapes from Decoder.__init__)."""
    ks = jax.random.split(key, 12)
    f32 = jnp.float32

    def lin(kw, kb, n_in, n_out):
        w = 0.1 * jax.random.normal(kw, (n_in, n_out), f32)
        b = 0.05 * jax.random.normal(kb, (1, n_out), f32)
        return w, b

    w1, b1 = lin(ks[0], ks[1], ZDIM, HSIZE)
    w2, b2 = lin(ks[2], ks[3], HSIZE, HSIZE)
    w3, b3 = lin(ks[4], ks[5], HSIZE, HSIZE)
    w4, b4 = lin(ks[6], ks[7], HSIZE, Q)

    g1 = 1.0 + 0.1 * jax.random.normal(ks[8], (1, HSIZE), f32)
    be1 = 0.1 * jax.random.normal(ks[9], (1, HSIZE), f32)
    rm1 = 0.05 * jax.random.normal(ks[10], (1, HSIZE), f32)
    rv1 = 1.0 + 0.1 * jax.random.uniform(ks[11], (1, HSIZE), f32)

    k2 = jax.random.split(jax.random.fold_in(key, 7), 4)
    g2 = 1.0 + 0.1 * jax.random.normal(k2[0], (1, HSIZE), f32)
    be2 = 0.1 * jax.random.normal(k2[1], (1, HSIZE), f32)
    rm2 = 0.05 * jax.random.normal(k2[2], (1, HSIZE), f32)
    rv2 = 1.0 + 0.1 * jax.random.uniform(k2[3], (1, HSIZE), f32)

    return [w1, b1, g1, be1, rm1, rv1,
            w2, b2,
            w3, b3, g2, be2, rm2, rv2,
            w4, b4]


def _fold_bn_into_next_linear(w_next, b_next, gamma, beta, rmean, rvar):
    """BN(h) @ W + b  ==  h @ (diag(s) W) + ((beta - rmean*s) @ W + b), s = g/sqrt(var+eps)."""
    s = gamma * jax.lax.rsqrt(rvar + BN_EPS)            # (1, H)
    w_f = w_next * s.reshape(-1, 1)                     # scale rows of W
    b_f = (beta - rmean * s) @ w_next + b_next          # (1, N)
    return w_f, b_f


def pack_params(params):
    """Fold eval-mode BNs and pack everything into one weight slab + one bias slab."""
    (w1, b1, g1, be1, rm1, rv1,
     w2, b2,
     w3, b3, g2, be2, rm2, rv2,
     w4, b4) = params

    w2f, b2f = _fold_bn_into_next_linear(w2, b2, g1, be1, rm1, rv1)
    w4f, b4f = _fold_bn_into_next_linear(w4, b4, g2, be2, rm2, rv2)

    pad = HSIZE - Q
    w4p = jnp.pad(w4f, ((0, 0), (0, pad)))              # (48, 48), cols Q: are zero
    b4p = jnp.pad(b4f, ((0, 0), (0, pad)))              # (1, 48)

    # Block-diagonal grouped-sum matrix (Q, Q), column-padded to HSIZE.
    row = jnp.arange(Q)[:, None] // AA_VAR
    col = jnp.arange(Q)[None, :] // AA_VAR
    gsum = (row == col).astype(jnp.float32)
    gsum = jnp.pad(gsum, ((0, 0), (0, pad)))            # (32, 48)

    w_slab = jnp.concatenate([w1, w2f, w3, w4p, gsum], axis=0)   # (192, 48)
    b_slab = jnp.concatenate([b1, b2f, b3, b4p], axis=0)         # (4, 48)
    return w_slab, b_slab


def decoder_reference(z, params):
    """Pure-JAX reference (unfolded params) for correctness check."""
    (w1, b1, g1, be1, rm1, rv1,
     w2, b2,
     w3, b3, g2, be2, rm2, rv2,
     w4, b4) = params
    lrelu = lambda v: jnp.where(v > 0, v, ALPHA * v)
    h = lrelu(z @ w1 + b1)
    h = (h - rm1) * jax.lax.rsqrt(rv1 + BN_EPS) * g1 + be1
    h = lrelu(h @ w2 + b2)
    h = lrelu(h @ w3 + b3)
    h = (h - rm2) * jax.lax.rsqrt(rv2 + BN_EPS) * g2 + be2
    logits = (h @ w4 + b4).reshape(z.shape[0], SEQ_LEN, AA_VAR)
    return jax.nn.softmax(logits, axis=2)


if __name__ == "__main__":
    key = jax.random.PRNGKey(0)
    kz, kp = jax.random.split(key)
    z = jax.random.normal(kz, (BATCH, ZDIM), jnp.float32)
    params = init_params(kp)
    w_slab, b_slab = pack_params(params)

    out = decoder_forward(z, w_slab, b_slab)
    out = jax.block_until_ready(out)

    ref = decoder_reference(z, params)
    assert out.shape == (BATCH, SEQ_LEN, AA_VAR)
    assert jnp.allclose(out, ref, rtol=1e-3, atol=2e-3), "mismatch vs reference"
    # rows of the softmax output must sum to 1
    assert jnp.allclose(jnp.sum(out, axis=2), 1.0, atol=1e-4)

    print("KERNEL_OK")
</pallas_src>

<mosaic_0001>
module attributes {stable_mosaic.version = 11 : i64} {
  func.func @decoder_kernel(%arg0: i32, %arg1: memref<16x16xf32, #tpu.memory_space<vmem>>, %arg2: memref<192x48xf32, #tpu.memory_space<vmem>>, %arg3: memref<4x48xf32, #tpu.memory_space<vmem>>, %arg4: memref<16x32xf32, #tpu.memory_space<vmem>>) attributes {dimension_semantics = [#tpu.dimension_semantics<parallel>], iteration_bounds = array<i64: 1>, scalar_prefetch = 0 : i64, scratch_operands = 0 : i64, tpu.core_type = #tpu.core_type<tc>, window_params = [{transform_indices = @transform_0, window_bounds = array<i64: 16, 16>}, {pipeline_mode = #tpu.pipeline_mode<synchronous>, transform_indices = @transform_1, window_bounds = array<i64: 192, 48>}, {pipeline_mode = #tpu.pipeline_mode<synchronous>, transform_indices = @transform_2, window_bounds = array<i64: 4, 48>}, {transform_indices = @transform_3, window_bounds = array<i64: 16, 32>}]} {
    %c0 = arith.constant 0 : index
    %c0_0 = arith.constant 0 : index
    %0 = vector.load %arg1[%c0, %c0_0] : memref<16x16xf32, #tpu.memory_space<vmem>>, vector<16x16xf32>
    %c0_1 = arith.constant 0 : index
    %c0_2 = arith.constant 0 : index
    %1 = vector.load %arg2[%c0_1, %c0_2] : memref<192x48xf32, #tpu.memory_space<vmem>>, vector<16x48xf32>
    %cst = arith.constant dense<0.000000e+00> : vector<16x48xf32>
    %2 = tpu.matmul %0, %1, %cst {dimension_numbers = #tpu.dot_dimension_numbers<[1], [0], [0], [1], [0, 0, 1, 1], [], []>} : vector<16x16xf32>, vector<16x48xf32>, vector<16x48xf32> -> vector<16x48xf32>
    %c0_3 = arith.constant 0 : index
    %c0_4 = arith.constant 0 : index
    %3 = vector.load %arg3[%c0_3, %c0_4] : memref<4x48xf32, #tpu.memory_space<vmem>>, vector<1x48xf32>
    %4 = vector.broadcast %3 : vector<1x48xf32> to vector<16x48xf32>
    %5 = arith.addf %2, %4 : vector<16x48xf32>
    %cst_5 = arith.constant 0.000000e+00 : f32
    %6 = vector.broadcast %cst_5 : f32 to vector<16x48xf32>
    %7 = arith.cmpf ogt, %5, %6 : vector<16x48xf32>
    %cst_6 = arith.constant 1.000000e-01 : f32
    %8 = vector.broadcast %cst_6 : f32 to vector<16x48xf32>
    %9 = arith.mulf %8, %5 : vector<16x48xf32>
    %10 = arith.select %7, %5, %9 : vector<16x48xi1>, vector<16x48xf32>
    %c16 = arith.constant 16 : index
    %c0_7 = arith.constant 0 : index
    %11 = vector.load %arg2[%c16, %c0_7] : memref<192x48xf32, #tpu.memory_space<vmem>>, vector<48x48xf32>
    %cst_8 = arith.constant dense<0.000000e+00> : vector<16x48xf32>
    %12 = tpu.matmul %10, %11, %cst_8 {dimension_numbers = #tpu.dot_dimension_numbers<[1], [0], [0], [1], [0, 0, 1, 1], [], []>} : vector<16x48xf32>, vector<48x48xf32>, vector<16x48xf32> -> vector<16x48xf32>
    %c1 = arith.constant 1 : index
    %c0_9 = arith.constant 0 : index
    %13 = vector.load %arg3[%c1, %c0_9] : memref<4x48xf32, #tpu.memory_space<vmem>>, vector<1x48xf32>
    %14 = vector.broadcast %13 : vector<1x48xf32> to vector<16x48xf32>
    %15 = arith.addf %12, %14 : vector<16x48xf32>
    %cst_10 = arith.constant 0.000000e+00 : f32
    %16 = vector.broadcast %cst_10 : f32 to vector<16x48xf32>
    %17 = arith.cmpf ogt, %15, %16 : vector<16x48xf32>
    %cst_11 = arith.constant 1.000000e-01 : f32
    %18 = vector.broadcast %cst_11 : f32 to vector<16x48xf32>
    %19 = arith.mulf %18, %15 : vector<16x48xf32>
    %20 = arith.select %17, %15, %19 : vector<16x48xi1>, vector<16x48xf32>
    %c64 = arith.constant 64 : index
    %c0_12 = arith.constant 0 : index
    %21 = vector.load %arg2[%c64, %c0_12] : memref<192x48xf32, #tpu.memory_space<vmem>>, vector<48x48xf32>
    %cst_13 = arith.constant dense<0.000000e+00> : vector<16x48xf32>
    %22 = tpu.matmul %20, %21, %cst_13 {dimension_numbers = #tpu.dot_dimension_numbers<[1], [0], [0], [1], [0, 0, 1, 1], [], []>} : vector<16x48xf32>, vector<48x48xf32>, vector<16x48xf32> -> vector<16x48xf32>
    %c2 = arith.constant 2 : index
    %c0_14 = arith.constant 0 : index
    %23 = vector.load %arg3[%c2, %c0_14] : memref<4x48xf32, #tpu.memory_space<vmem>>, vector<1x48xf32>
    %24 = vector.broadcast %23 : vector<1x48xf32> to vector<16x48xf32>
    %25 = arith.addf %22, %24 : vector<16x48xf32>
    %cst_15 = arith.constant 0.000000e+00 : f32
    %26 = vector.broadcast %cst_15 : f32 to vector<16x48xf32>
    %27 = arith.cmpf ogt, %25, %26 : vector<16x48xf32>
    %cst_16 = arith.constant 1.000000e-01 : f32
    %28 = vector.broadcast %cst_16 : f32 to vector<16x48xf32>
    %29 = arith.mulf %28, %25 : vector<16x48xf32>
    %30 = arith.select %27, %25, %29 : vector<16x48xi1>, vector<16x48xf32>
    %c112 = arith.constant 112 : index
    %c0_17 = arith.constant 0 : index
    %31 = vector.load %arg2[%c112, %c0_17] : memref<192x48xf32, #tpu.memory_space<vmem>>, vector<48x48xf32>
    %cst_18 = arith.constant dense<0.000000e+00> : vector<16x48xf32>
    %32 = tpu.matmul %30, %31, %cst_18 {dimension_numbers = #tpu.dot_dimension_numbers<[1], [0], [0], [1], [0, 0, 1, 1], [], []>} : vector<16x48xf32>, vector<48x48xf32>, vector<16x48xf32> -> vector<16x48xf32>
    %c3 = arith.constant 3 : index
    %c0_19 = arith.constant 0 : index
    %33 = vector.load %arg3[%c3, %c0_19] : memref<4x48xf32, #tpu.memory_space<vmem>>, vector<1x48xf32>
    %34 = vector.broadcast %33 : vector<1x48xf32> to vector<16x48xf32>
    %35 = arith.addf %32, %34 : vector<16x48xf32>
    %36 = vector.extract_strided_slice %35 {offsets = [0, 0], sizes = [16, 32], strides = [1, 1]} : vector<16x48xf32> to vector<16x32xf32>
    %37 = vector.shape_cast %36 : vector<16x32xf32> to vector<16x8x4xf32>
    %cst_20 = arith.constant dense<0xFF800000> : vector<16x8xf32>
    %38 = vector.multi_reduction <maximumf>, %37, %cst_20 [2] : vector<16x8x4xf32> to vector<16x8xf32>
    %39 = vector.shape_cast %38 : vector<16x8xf32> to vector<16x8x1xf32>
    %40 = vector.broadcast %39 : vector<16x8x1xf32> to vector<16x8x4xf32>
    %41 = arith.subf %37, %40 : vector<16x8x4xf32>
    %42 = math.exp %41 : vector<16x8x4xf32>
    %43 = vector.shape_cast %42 : vector<16x8x4xf32> to vector<16x32xf32>
    %c160 = arith.constant 160 : index
    %c0_21 = arith.constant 0 : index
    %44 = vector.load %arg2[%c160, %c0_21] : memref<192x48xf32, #tpu.memory_space<vmem>>, vector<32x48xf32>
    %cst_22 = arith.constant dense<0.000000e+00> : vector<16x48xf32>
    %45 = tpu.matmul %43, %44, %cst_22 {dimension_numbers = #tpu.dot_dimension_numbers<[1], [0], [0], [1], [0, 0, 1, 1], [], []>} : vector<16x32xf32>, vector<32x48xf32>, vector<16x48xf32> -> vector<16x48xf32>
    %46 = vector.extract_strided_slice %45 {offsets = [0, 0], sizes = [16, 32], strides = [1, 1]} : vector<16x48xf32> to vector<16x32xf32>
    %47 = arith.divf %43, %46 : vector<16x32xf32>
    %c0_23 = arith.constant 0 : index
    %c0_24 = arith.constant 0 : index
    %48 = vector.load %arg4[%c0_23, %c0_24] : memref<16x32xf32, #tpu.memory_space<vmem>>, vector<16x32xf32>
    tpu.vector_store %arg4[%c0_23, %c0_24], %47 {strides = array<i32>} : memref<16x32xf32, #tpu.memory_space<vmem>>, vector<16x32xf32>,
    return
  }
  func.func @transform_0(%arg0: i32) -> (i32, i32) {
    %c0_i32 = arith.constant 0 : i32
    %c0_i32_0 = arith.constant 0 : i32
    return %arg0, %c0_i32 : i32, i32
  }
  func.func @transform_1(%arg0: i32) -> (i32, i32) {
    %c0_i32 = arith.constant 0 : i32
    %c0_i32_0 = arith.constant 0 : i32
    %c0_i32_1 = arith.constant 0 : i32
    return %c0_i32, %c0_i32_0 : i32, i32
  }
  func.func @transform_2(%arg0: i32) -> (i32, i32) {
    %c0_i32 = arith.constant 0 : i32
    %c0_i32_0 = arith.constant 0 : i32
    %c0_i32_1 = arith.constant 0 : i32
    return %c0_i32, %c0_i32_0 : i32, i32
  }
  func.func @transform_3(%arg0: i32) -> (i32, i32) {
    %c0_i32 = arith.constant 0 : i32
    %c0_i32_0 = arith.constant 0 : i32
    return %arg0, %c0_i32 : i32, i32
  }
}

</mosaic_0001>

<bundles_post_ra>
// kernel: tpu_custom_call.1
= control target key start
LH: loop header
LB: loop body
LE: loop exit
PB: predicated region body
PF: predicated region fallthrough
CT: control target
= control target key end

     0   :  { %vm21_vm0 = vcmask 130048   ;;  %s1494_s0 = inlined_call_operand.vmem [shape: f32[16,16], index: 0, kind: input, shape index: {}]   ;;  %s1495_s1 = inlined_call_operand.vmem [shape: f32[192,48], index: 1, kind: input, shape index: {}]   ;;  %s1496_s2 = inlined_call_operand.vmem [shape: f32[4,48], index: 2, kind: input, shape index: {}]   ;;  %s1497_s3 = inlined_call_operand.hbm [shape: f32[16,32], index: 3, kind: output, shape index: {}]  }
   0x1   :  { %v18_v0 = vld [vmem:[%s1495_s1 + $0x8] sm:$0xff]  ;;  %v17_v1 = vld [vmem:[%s1495_s1] sm:$0xff]  ;;  %v62_v4 = vld [vmem:[%s1495_s1 + $0x38] sm:$0xff] }
   0x2   :  { %42 = vmatpush.msra.mxu0 %v18_v0  ;;  %v15_v2 = vld [vmem:[%s1494_s0] sm:$0xff]  ;;  %940 = vmatpush.msra.mxu1 %v18_v0  ;;  %v16_v3 = vld [vmem:[%s1494_s0 + $0x8] sm:$0xff]  ;;  %v61_v5 = vld [vmem:[%s1495_s1 + $0x30] sm:$0xff] }
   0x4   :  { %43 = vmatpush.msra.mxu0 %v17_v1  ;;  %941 = vmatpush.msra.mxu1 %v17_v1 }
   0x5   :  { %930 = vmatmul.msk.f32.vlgmr.msra.gmra.mxu0 %vm21_vm0, %v15_v2  ;;  %931 = vmatmul.msk.f32.vlgmr.msra.gmra.mxu1 %vm21_vm0, %v16_v3 }
   0x6   :  { %8 = vsyncpa [#allocation3], 0  ;;  %82 = vmatpush.msrb.mxu1 %v62_v4  ;;  %v60_v6 = vld [vmem:[%s1495_s1 + $0x28] sm:$0xff]  ;;  %v59_v7 = vld [vmem:[%s1495_s1 + $0x20] sm:$0xff]  ;;  %vm65_vm2 = vcmask 392192   ;;  %s1026_s8 = smov 124  }
   0x7   :  { %v58_v8 = vld [vmem:[%s1495_s1 + $0x18] sm:$0xff]  ;;  %v57_v9 = vld [vmem:[%s1495_s1 + $0x10] sm:$0xff]  ;;  %v106_v10 = vld [vmem:[%s1495_s1 + $0x68] sm:$0xff]  ;;  %s1027_s9 = smov 116   ;;  %s1028_s10 = smov 120   ;;  %vm226_vm8 = vcmask 1047556  }
   0x8   :  { %83 = vmatpush.msrb.mxu1 %v61_v5  ;;  %v105_v11 = vld [vmem:[%s1495_s1 + $0x60] sm:$0xff]  ;;  %125 = vmatpush.msra.mxu2 %v106_v10  ;;  %v104_v12 = vld [vmem:[%s1495_s1 + $0x58] sm:$0xff]  ;;  %v103_v22 = vld [vmem:[%s1495_s1 + $0x50] sm:$0xff]  ;;  %s1029_s11 = smov 108   ;;  %s1030_s12 = smov 104   ;;  %vm450_vm9 = vcmask 31744  }
   0x9   :  { %v960_v13 = vld [vmem:[%s1496_s2] ss:$0 sm:$0xff]  ;;  %v102_v23 = vld [vmem:[%s1495_s1 + $0x48] sm:$0xff]  ;;  %v149_v25 = vld [vmem:[%s1495_s1 + $0x98] sm:$0xff]  ;;  %s1031_s13 = smov 112   ;;  %s1035_s14 = smov 8  }
   0xa   :  { %84 = vmatpush.msrb.mxu1 %v60_v6  ;;  %126 = vmatpush.msra.mxu2 %v105_v11  ;;  %v101_v24 = vld [vmem:[%s1495_s1 + $0x40] sm:$0xff]  ;;  %v148_v26 = vld [vmem:[%s1495_s1 + $0x90] sm:$0xff]  ;;  %v147_v27 = vld [vmem:[%s1495_s1 + $0x88] sm:$0xff]  ;;  %v1033_v56 = vmov 1983009808   ;;  %s1036_s15 = smov 4  }
   0xb   :  { %168 = vmatpush.msra.mxu3 %v149_v25  ;;  %v961_v28 = vld [vmem:[%s1496_s2 + $0x1] ss:$0 sm:$0xff]  ;;  %v145_v38 = vld [vmem:[%s1495_s1 + $0x78] sm:$0xff]  ;;  %v144_v39 = vld [vmem:[%s1495_s1 + $0x70] sm:$0xff]  ;;  %v231_v57 = vunpack.c.l.s4 %v1033_v56  ;;  %v1034_v11 = vmov 1934713408  }
   0xc   :  { %85 = vmatpush.msrb.mxu1 %v59_v7  ;;  %127 = vmatpush.msra.mxu2 %v104_v12  ;;  %v146_v37 = vld [vmem:[%s1495_s1 + $0x80] sm:$0xff]  ;;  %v279_v12 = vunpack.c.l.s4 %v1034_v11  ;;  %s1037_s16 = smov 12   ;;  %s1038_s17 = smov 16   ;;  %vm829_vm10 = vcmask 64512   ;;  %vm832_vm11 = vcmask 97280   ;;  %vm837_vm12 = vcmask 162816  }
   0xd   :  { %169 = vmatpush.msra.mxu3 %v148_v26  ;;  %v962_v40 = vld [vmem:[%s1496_s2 + $0x2] ss:$0 sm:$0xff]  ;;  %v963_v49 = vld [vmem:[%s1496_s2 + $0x3] ss:$0 sm:$0xff]  ;;  %s1032_s2 = smov 100   ;;  %v1159_v61 = vunpack.c.0.s8 %v231_v57  ;;  %s1039_s18 = smov 20  }
   0xe   :  { %86 = vmatpush.msrb.mxu1 %v58_v8  ;;  %128 = vmatpush.msra.mxu2 %v103_v22  ;;  %s1040_s19 = smov 24   ;;  %s1041_s20 = smov 28   ;;  %vm840_vm13 = vcmask 195584   ;;  %vm843_vm14 = vcmask 228352   ;;  %vm850_vm15 = vcmask 261120  }
   0xf   :  { %170 = vmatpush.msra.mxu3 %v147_v27  ;;  %s918_s29 = sshll.u32 %s1497_s3, 4  ;;  %s1042_s30 = smov [#allocation2]   ;;  %s919_s29 = int_to_ptr.hbm [resolvable:$true] %s918_s29 }
  0x10   :  { %87 = vmatpush.msrb.mxu1 %v57_v9  ;;  %129 = vmatpush.msra.mxu2 %v102_v23  ;;  %s916_s4 = sshll.u32 %s1042_s30, 4  ;;  %s1043_s5 = smov 128   ;;  %s917_s4 = int_to_ptr.vmem [resolvable:$true] %s916_s4 }
  0x11   :  { %171 = vmatpush.msra.mxu3 %v146_v37 }
  0x12   :  { %130 = vmatpush.msra.mxu2 %v101_v24 }
  0x13   :  { %172 = vmatpush.msra.mxu3 %v145_v38 }
  0x15   :  { %173 = vmatpush.msra.mxu3 %v144_v39 }
  0x82   :  { %v45_v14 = vpop.f32.mrf.mxu0  ;;  %v48_v15 = vpop.f32.mrf.mxu1 }
  0x83   :  { %v46_v16 = vadd.f32 %v960_v13, %v45_v14  ;;  %v49_v18 = vadd.f32 %v960_v13, %v48_v15 }
  0x85   :  { %vm51_vm1 = vcmp.gt.f32.partialorder %v46_v16, 0.0  ;;  %v53_v17 = vmul.f32 0.1, %v46_v16  ;;  %v54_v20 = vmul.f32 0.1, %v49_v18  ;;  %vm52_vm3 = vcmp.gt.f32.partialorder %v49_v18, 0.0 }
  0x87   :  { %v55_v19 = vsel %vm51_vm1, %v46_v16, %v53_v17  ;;  %v56_v21 = vsel %vm52_vm3, %v49_v18, %v54_v20 }
  0x88   :  { %932 = vmatmul.msk.f32.vlgmr.msrb.gmra.mxu1 %vm65_vm2, %v55_v19  ;;  %v1173_v19 = vunpack.c.0.s8 %v279_v12 }
  0x90   :  { %933 = vmatmul.msk.f32.gmra.mxu1 %vm65_vm2, %v56_v21 }
 0x105   :  { %v89_v29 = vpop.f32.mrf.mxu1 }
 0x106   :  { %v90_v30 = vadd.f32 %v961_v28, %v89_v29 }
 0x108   :  { %v97_v31 = vmul.f32 0.1, %v90_v30  ;;  %vm95_vm4 = vcmp.gt.f32.partialorder %v90_v30, 0.0 }
 0x10a   :  { %v99_v32 = vsel %vm95_vm4, %v90_v30, %v97_v31 }
 0x10b   :  { %934 = vmatmul.msk.f32.vlgmr.msra.gmra.mxu2 %vm65_vm2, %v99_v32 }
 0x10d   :  { %v92_v33 = vpop.f32.mrf.mxu1 }
 0x10e   :  { %v93_v34 = vadd.f32 %v961_v28, %v92_v33 }
 0x110   :  { %v98_v35 = vmul.f32 0.1, %v93_v34  ;;  %vm96_vm5 = vcmp.gt.f32.partialorder %v93_v34, 0.0 }
 0x112   :  { %v100_v36 = vsel %vm96_vm5, %v93_v34, %v98_v35 }
 0x113   :  { %935 = vmatmul.msk.f32.gmra.mxu2 %vm65_vm2, %v100_v36 }
 0x18e   :  { %v132_v41 = vpop.f32.mrf.mxu2 }
 0x18f   :  { %v133_v42 = vadd.f32 %v962_v40, %v132_v41 }
 0x191   :  { %v140_v43 = vmul.f32 0.1, %v133_v42  ;;  %vm138_vm6 = vcmp.gt.f32.partialorder %v133_v42, 0.0 }
 0x193   :  { %v142_v44 = vsel %vm138_vm6, %v133_v42, %v140_v43 }
 0x194   :  { %936 = vmatmul.msk.f32.vlgmr.msra.gmra.mxu3 %vm65_vm2, %v142_v44 }
 0x196   :  { %v135_v45 = vpop.f32.mrf.mxu2 }
 0x197   :  { %v136_v46 = vadd.f32 %v962_v40, %v135_v45 }
 0x199   :  { %v141_v47 = vmul.f32 0.1, %v136_v46  ;;  %vm139_vm7 = vcmp.gt.f32.partialorder %v136_v46, 0.0 }
 0x19b   :  { %v143_v48 = vsel %vm139_vm7, %v136_v46, %v141_v47 }
 0x19c   :  { %937 = vmatmul.msk.f32.gmra.mxu3 %vm65_vm2, %v143_v48 }
 0x217   :  { %v175_v50 = vpop.f32.mrf.mxu3 }
 0x218   :  { %v176_v51 = vadd.f32 %v963_v49, %v175_v50 }
 0x21a   :  { %183 = vrot.lane.b32.xlu2 %v176_v51, %s1026_s8  ;;  %195 = vrot.lane.b32.xlu1 %v176_v51, %s1027_s9  ;;  %v228_v60 = vrot.slane %v176_v51, 4 }
 0x21b   :  { %189 = vrot.lane.b32.xlu0 %v176_v51, %s1028_s10 }
 0x21f   :  { %v178_v52 = vpop.f32.mrf.mxu3 }
 0x220   :  { %v1150_v53 = vadd.f32 %v963_v49, %v178_v52 }
 0x222   :  { %207 = vrot.lane.b32.xlu2 %v176_v51, %s1029_s11  ;;  %213 = vrot.lane.b32.xlu1 %v176_v51, %s1030_s12  ;;  %v340_v28 = vrot.slane %v1150_v53, 4 }
 0x223   :  { %201 = vrot.lane.b32.xlu0 %v176_v51, %s1031_s13 }
 0x22a   :  { %203 = vrot.lane.b32.xlu2 %v1150_v53, %s1031_s13  ;;  %191 = vrot.lane.b32.xlu1 %v1150_v53, %s1028_s10 }
 0x22b   :  { %219 = vrot.lane.b32.xlu0 %v176_v51, %s1032_s2 }
 0x232   :  { %185 = vrot.lane.b32.xlu2 %v1150_v53, %s1026_s8  ;;  %215 = vrot.lane.b32.xlu1 %v1150_v53, %s1030_s12 }
 0x233   :  { %197 = vrot.lane.b32.xlu0 %v1150_v53, %s1027_s9 }
 0x23a   :  { %221 = vrot.lane.b32.xlu1 %v1150_v53, %s1032_s2 }
 0x23b   :  { %209 = vrot.lane.b32.xlu0 %v1150_v53, %s1029_s11 }
 0x274   :  { %v184_v54 = vpop.permute.xlu2 %183 }
 0x275   :  { %v240_v1 = vrot.slane %v184_v54, 4 }
 0x27c   :  { %v208_v55 = vpop.permute.xlu2 %207 }
 0x27d   :  { %v264_v23 = vrot.slane %v208_v55, 4 }
 0x284   :  { %v1164_v5 = vpop.permute.xlu2 %203 }
 0x285   :  { %v364_v34 = vrot.slane %v1164_v5, 4 }
 0x28c   :  { %v196_v58 = vpop.permute.xlu1 %195  ;;  %v186_v35 = vpop.permute.xlu2 %185 }
 0x28d   :  { %v190_v59 = vpop.permute.xlu0 %189  ;;  %v238_v63 = vrot.slane %v196_v58, 4  ;;  %v241_v3 = vsel %vm226_vm8, %v196_v58, %v240_v1  ;;  %v352_v47 = vrot.slane %v186_v35, 4 }
 0x28e   :  { %v229_v62 = vsel %vm226_vm8, %v190_v59, %v228_v60  ;;  %v225_v0 = vrot.slane %v190_v59, 4  ;;  %v249_v13 = vperm.slane %v241_v3, %v1159_v61 }
 0x28f   :  { %v237_v2 = vperm.slane %v229_v62, %v1159_v61  ;;  %v239_v6 = vsel %vm226_vm8, %v238_v63, %v184_v54 }
 0x290   :  { %v227_v7 = vsel %vm226_vm8, %v225_v0, %v176_v51  ;;  %v245_v15 = vperm.slane %v239_v6, %v1159_v61  ;;  %v286_v20 = vrot.slane %v249_v13, 4 }
 0x291   :  { %v288_v14 = vrot.slane %v237_v2, 4  ;;  %v233_v16 = vperm.slane %v227_v7, %v1159_v61 }
 0x292   :  { %v274_v24 = vrot.slane %v245_v15, 4  ;;  %v287_v38 = vsel %vm226_vm8, %v286_v20, %v237_v2 }
 0x293   :  { %v289_v22 = vsel %vm226_vm8, %v249_v13, %v288_v14  ;;  %v276_v25 = vrot.slane %v233_v16, 4  ;;  %v293_v50 = vperm.slane %v287_v38, %v1173_v19 }
 0x294   :  { %v214_v4 = vpop.permute.xlu1 %213  ;;  %v297_v33 = vperm.slane %v289_v22, %v1173_v19  ;;  %v275_v41 = vsel %vm226_vm8, %v274_v24, %v233_v16 }
 0x295   :  { %v250_v8 = vrot.slane %v214_v4, 4  ;;  %v202_v9 = vpop.permute.xlu0 %201  ;;  %v277_v42 = vsel %vm226_vm8, %v245_v15, %v276_v25  ;;  %v1194_v52 = vperm.slane %v275_v41, %v1173_v19 }
 0x296   :  { %v252_v10 = vrot.slane %v202_v9, 4  ;;  %v336_v49 = vrot.slane %v297_v33, 4  ;;  %v285_v59 = vperm.slane %v277_v42, %v1173_v19 }
 0x297   :  { %v251_v18 = vsel %vm226_vm8, %v250_v8, %v202_v9 }
 0x298   :  { %v253_v17 = vsel %vm226_vm8, %v214_v4, %v252_v10  ;;  %v257_v26 = vperm.slane %v251_v18, %v1159_v61  ;;  %v324_v10 = vrot.slane %v1194_v52, 4  ;;  %v328_v14 = vrot.slane %v285_v59, 4 }
 0x299   :  { %v261_v21 = vperm.slane %v253_v17, %v1159_v61 }
 0x29a   :  { %v300_v39 = vrot.slane %v257_v26, 4 }
 0x29b   :  { %v312_v36 = vrot.slane %v261_v21, 4 }
 0x29c   :  { %v192_v27 = vpop.permute.xlu1 %191 }
 0x29d   :  { %v338_v29 = vrot.slane %v192_v27, 4  ;;  %v220_v30 = vpop.permute.xlu0 %219  ;;  %v341_v60 = vsel %vm226_vm8, %v192_v27, %v340_v28 }
 0x29e   :  { %v262_v31 = vrot.slane %v220_v30, 4  ;;  %v265_v32 = vsel %vm226_vm8, %v220_v30, %v264_v23  ;;  %v1222_v11 = vperm.slane %v341_v60, %v1159_v61 }
 0x29f   :  { %v273_v37 = vperm.slane %v265_v32, %v1159_v61  ;;  %v339_v43 = vsel %vm226_vm8, %v338_v29, %v1150_v53  ;;  %v332_v32 = vrot.slane %v293_v50, 4 }
 0x2a0   :  { %v263_v40 = vsel %vm226_vm8, %v262_v31, %v208_v55  ;;  %v1199_v53 = vperm.slane %v339_v43, %v1159_v61 }
 0x2a1   :  { %v269_v44 = vperm.slane %v263_v40, %v1159_v61  ;;  %v310_v45 = vrot.slane %v273_v37, 4  ;;  %v313_v46 = vsel %vm226_vm8, %v273_v37, %v312_v36 }
 0x2a2   :  { %v321_v48 = vperm.slane %v313_v46, %v1173_v19  ;;  %v388_v12 = vrot.slane %v1199_v53, 4 }
 0x2a3   :  { %v298_v51 = vrot.slane %v269_v44, 4  ;;  %v301_v54 = vsel %vm226_vm8, %v269_v44, %v300_v39  ;;  %v311_v55 = vsel %vm226_vm8, %v310_v45, %v261_v21 }
 0x2a4   :  { %v216_v56 = vpop.permute.xlu1 %215  ;;  %v1202_v57 = vsel %vm226_vm8, %v321_v48, %v336_v49  ;;  %v334_v58 = vrot.slane %v321_v48, 4  ;;  %v309_v4 = vperm.slane %v301_v54, %v1173_v19  ;;  %v317_v6 = vperm.slane %v311_v55, %v1173_v19 }
 0x2a5   :  { %v362_v62 = vrot.slane %v216_v56, 4  ;;  %v198_v63 = vpop.permute.xlu0 %197  ;;  %v472_v0 = vsel %vm450_vm9, %v1202_v57, -inf  ;;  %v299_v1 = vsel %vm226_vm8, %v298_v51, %v257_v26  ;;  %v365_v16 = vsel %vm226_vm8, %v216_v56, %v364_v34 }
 0x2a6   :  { %v350_v2 = vrot.slane %v198_v63, 4  ;;  %473 = vmax.xlane.f32.xlu2 %v472_v0  ;;  %v1210_v3 = vsel %vm226_vm8, %v334_v58, %v297_v33  ;;  %v353_v7 = vsel %vm226_vm8, %v198_v63, %v352_v47  ;;  %v1218_v9 = vperm.slane %v299_v1, %v1173_v19 }
 0x2a7   :  { %v469_v8 = vsel %vm450_vm9, %v1210_v3, -inf  ;;  %v363_v15 = vsel %vm226_vm8, %v362_v62, %v1164_v5  ;;  %v361_v20 = vperm.slane %v353_v7, %v1159_v61  ;;  %v1238_v22 = vsel %vm226_vm8, %v309_v4, %v328_v14 }
 0x2a8   :  { %v351_v13 = vsel %vm226_vm8, %v350_v2, %v186_v35  ;;  %470 = vmax.xlane.f32.xlu0 %v469_v8  ;;  %v1232_v18 = vsel %vm226_vm8, %v1218_v9, %v324_v10  ;;  %v330_v23 = vrot.slane %v317_v6, 4  ;;  %v400_v5 = vrot.slane %v1222_v11, 4 }
 0x2a9   :  { %v357_v17 = vperm.slane %v351_v13, %v1159_v61  ;;  %v454_v21 = vsel %vm450_vm9, %v1232_v18, -inf  ;;  %v369_v24 = vperm.slane %v363_v15, %v1159_v61  ;;  %v373_v28 = vperm.slane %v365_v16, %v1159_v61 }
 0x2aa   :  { %455 = vmax.xlane.f32.xlu1 %v454_v21  ;;  %v1243_v26 = vsel %vm226_vm8, %v330_v23, %v293_v50  ;;  %v460_v31 = vsel %vm450_vm9, %v1238_v22, -inf  ;;  %v401_v33 = vsel %vm226_vm8, %v361_v20, %v400_v5  ;;  %v326_v35 = vrot.slane %v309_v4, 4 }
 0x2ab   :  { %v389_v27 = vsel %vm226_vm8, %v357_v17, %v388_v12  ;;  %v463_v37 = vsel %vm450_vm9, %v1243_v26, -inf  ;;  %v1254_v38 = vsel %vm226_vm8, %v317_v6, %v332_v32  ;;  %v412_v40 = vrot.slane %v369_v24, 4 }
 0x2ac   :  { %v222_v25 = vpop.permute.xlu1 %221  ;;  %v397_v39 = vperm.slane %v389_v27, %v1173_v19  ;;  %v424_v43 = vrot.slane %v373_v28, 4  ;;  %v409_v45 = vperm.slane %v401_v33, %v1173_v19  ;;  %v466_v46 = vsel %vm450_vm9, %v1254_v38, -inf }
 0x2ad   :  { %v374_v29 = vrot.slane %v222_v25, 4  ;;  %v210_v30 = vpop.permute.xlu0 %209  ;;  %v1264_v47 = vsel %vm226_vm8, %v326_v35, %v285_v59  ;;  %v386_v55 = vrot.slane %v357_v17, 4  ;;  %v322_v62 = vrot.slane %v1218_v9, 4 }
 0x2ae   :  { %v376_v34 = vrot.slane %v210_v30, 4  ;;  %461 = vmax.xlane.f32.xlu2 %v460_v31  ;;  %v440_v50 = vrot.slane %v397_v39, 4  ;;  %v457_v56 = vsel %vm450_vm9, %v1264_v47, -inf  ;;  %v448_v60 = vrot.slane %v409_v45, 4 }
 0x2af   :  { %v375_v36 = vsel %vm226_vm8, %v374_v29, %v210_v30  ;;  %v398_v63 = vrot.slane %v361_v20, 4  ;;  %v387_v6 = vsel %vm226_vm8, %v386_v55, %v1199_v53  ;;  %v1287_v8 = vsel %vm226_vm8, %v322_v62, %v1194_v52 }
 0x2b0   :  { %v377_v41 = vsel %vm226_vm8, %v222_v25, %v376_v34  ;;  %v381_v42 = vperm.slane %v375_v36, %v1159_v61  ;;  %464 = vmax.xlane.f32.xlu0 %v463_v37  ;;  %v393_v14 = vperm.slane %v387_v6, %v1173_v19  ;;  %v451_v53 = vsel %vm450_vm9, %v1287_v8, -inf }
 0x2b1   :  { %v385_v44 = vperm.slane %v377_v41, %v1159_v61  ;;  %v399_v12 = vsel %vm226_vm8, %v398_v63, %v1222_v11 }
 0x2b2   :  { %v413_v48 = vsel %vm226_vm8, %v381_v42, %v412_v40  ;;  %467 = vmax.xlane.f32.xlu1 %v466_v46  ;;  %v410_v0 = vrot.slane %v381_v42, 4  ;;  %v405_v16 = vperm.slane %v399_v12, %v1173_v19  ;;  %v436_v20 = vrot.slane %v393_v14, 4 }
 0x2b3   :  { %v421_v49 = vperm.slane %v413_v48, %v1173_v19  ;;  %v425_v51 = vsel %vm226_vm8, %v385_v44, %v424_v43  ;;  %v422_v4 = vrot.slane %v385_v44, 4 }
 0x2b4   :  { %v433_v54 = vperm.slane %v425_v51, %v1173_v19  ;;  %v411_v10 = vsel %vm226_vm8, %v410_v0, %v369_v24  ;;  %v444_v24 = vrot.slane %v405_v16, 4 }
 0x2b5   :  { %v1273_v58 = vsel %vm226_vm8, %v421_v49, %v440_v50  ;;  %v438_v2 = vrot.slane %v421_v49, 4  ;;  %v423_v15 = vsel %vm226_vm8, %v422_v4, %v373_v28  ;;  %v417_v52 = vperm.slane %v411_v10, %v1173_v19 }
 0x2b6   :  { %458 = vmax.xlane.f32.xlu2 %v457_v56  ;;  %v484_v59 = vsel %vm450_vm9, %v1273_v58, -inf  ;;  %v1279_v1 = vsel %vm226_vm8, %v433_v54, %v448_v60  ;;  %v446_v9 = vrot.slane %v433_v54, 4  ;;  %v429_v21 = vperm.slane %v423_v15, %v1173_v19 }
 0x2b7   :  { %v496_v7 = vsel %vm450_vm9, %v1279_v1, -inf  ;;  %v1293_v13 = vsel %vm226_vm8, %v438_v2, %v397_v39  ;;  %v1310_v5 = vsel %vm226_vm8, %v417_v52, %v436_v20  ;;  %v434_v25 = vrot.slane %v417_v52, 4 }
 0x2b8   :  { %485 = vmax.xlane.f32.xlu0 %v484_v59  ;;  %v481_v17 = vsel %vm450_vm9, %v1293_v13, -inf  ;;  %v1304_v11 = vsel %vm226_vm8, %v446_v9, %v409_v45  ;;  %v1313_v27 = vsel %vm226_vm8, %v429_v21, %v444_v24  ;;  %v478_v28 = vsel %vm450_vm9, %v1310_v5, -inf }
 0x2b9   :  { %v493_v23 = vsel %vm450_vm9, %v1304_v11, -inf  ;;  %v442_v29 = vrot.slane %v429_v21, 4  ;;  %v490_v30 = vsel %vm450_vm9, %v1313_v27, -inf  ;;  %v1320_v31 = vsel %vm226_vm8, %v434_v25, %v393_v14 }
 0x2ba   :  { %497 = vmax.xlane.f32.xlu1 %v496_v7  ;;  %v475_v32 = vsel %vm450_vm9, %v1320_v31, -inf }
 0x2bb   :  { %v1325_v33 = vsel %vm226_vm8, %v442_v29, %v405_v16 }
 0x2bc   :  { %v487_v34 = vsel %vm450_vm9, %v1325_v33, -inf }
 0x2be   :  { %452 = vmax.xlane.f32.xlu2 %v451_v53 }
 0x2c0   :  { %482 = vmax.xlane.f32.xlu0 %v481_v17 }
 0x2c2   :  { %494 = vmax.xlane.f32.xlu1 %v493_v23 }
 0x2c6   :  { %479 = vmax.xlane.f32.xlu2 %v478_v28 }
 0x2c8   :  { %491 = vmax.xlane.f32.xlu0 %v490_v30 }
 0x2ca   :  { %476 = vmax.xlane.f32.xlu1 %v475_v32 }
 0x2ce   :  { %488 = vmax.xlane.f32.xlu2 %v487_v34 }
 0x319   :  { %v474_v35 = vpop.xlane.xlu2 %473 }
 0x31a   :  { %v506_v39 = vsub.f32 %v1202_v57, %v474_v35 }
 0x31b   :  { %v471_v36 = vpop.xlane.xlu0 %470 }
 0x31c   :  { %v505_v37 = vsub.f32 %v1210_v3, %v471_v36  ;;  %v529_v43 = vmul.f32 1.442695, %v506_v39 }
 0x31d   :  { %v456_v40 = vpop.xlane.xlu1 %455 }
 0x31e   :  { %v500_v41 = vsub.f32 %v1232_v18, %v456_v40  ;;  %v527_v42 = vmul.f32 1.442695, %v505_v37 }
 0x320   :  { %v517_v45 = vmul.f32 1.442695, %v500_v41  ;;  %964 = vpow2.f32 %v527_v42 }
 0x321   :  { %v462_v44 = vpop.xlane.xlu2 %461  ;;  %966 = vpow2.f32 %v529_v43 }
 0x322   :  { %v502_v46 = vsub.f32 %v1238_v22, %v462_v44  ;;  %968 = vpow2.f32 %v517_v45 }
 0x323   :  { %v465_v48 = vpop.xlane.xlu0 %464 }
 0x324   :  { %v521_v49 = vmul.f32 1.442695, %v502_v46  ;;  %v503_v50 = vsub.f32 %v1243_v26, %v465_v48 }
 0x325   :  { %v468_v3 = vpop.xlane.xlu1 %467 }
 0x326   :  { %v523_v51 = vmul.f32 1.442695, %v503_v50  ;;  %970 = vpow2.f32 %v521_v49  ;;  %v504_v57 = vsub.f32 %v1254_v38, %v468_v3  ;;  %v965_v55 = vpop.eup %964 }
 0x327   :  { %v967_v60 = vpop.eup %966  ;;  %v571_v63 = vrot.slane %v965_v55, 4 }
 0x328   :  { %972 = vpow2.f32 %v523_v51  ;;  %v525_v18 = vmul.f32 1.442695, %v504_v57  ;;  %v969_v59 = vpop.eup %968  ;;  %v583_v6 = vrot.slane %v967_v60, 4 }
 0x329   :  { %v459_v54 = vpop.xlane.xlu2 %458  ;;  %v561_v9 = vrot.slane %v969_v59, 4 }
 0x32a   :  { %v501_v56 = vsub.f32 %v1264_v47, %v459_v54  ;;  %974 = vpow2.f32 %v525_v18 }
 0x32b   :  { %v486_v22 = vpop.xlane.xlu0 %485 }
 0x32c   :  { %v971_v62 = vpop.eup %970  ;;  %v519_v0 = vmul.f32 1.442695, %v501_v56  ;;  %v510_v47 = vsub.f32 %v1273_v58, %v486_v22 }
 0x32d   :  { %v498_v2 = vpop.xlane.xlu1 %497  ;;  %v559_v10 = vrot.slane %v971_v62, 4  ;;  %v562_v20 = vsel %vm226_vm8, %v971_v62, %v561_v9 }
 0x32e   :  { %v973_v26 = vpop.eup %972  ;;  %976 = vpow2.f32 %v519_v0  ;;  %v514_v53 = vsub.f32 %v1279_v1, %v498_v2  ;;  %v537_v28 = vmul.f32 1.442695, %v510_v47  ;;  %v1348_v30 = vperm.slane %v562_v20, %v1159_v61 }
 0x32f   :  { %v572_v4 = vsel %vm226_vm8, %v571_v63, %v973_v26  ;;  %v573_v12 = vrot.slane %v973_v26, 4  ;;  %v560_v29 = vsel %vm226_vm8, %v559_v10, %v969_v59 }
 0x330   :  { %v578_v38 = vperm.slane %v572_v4, %v1159_v61  ;;  %v975_v7 = vpop.eup %974  ;;  %v545_v1 = vmul.f32 1.442695, %v514_v53  ;;  %v566_v36 = vperm.slane %v560_v29, %v1159_v61  ;;  %v607_v43 = vrot.slane %v1348_v30, 4 }
 0x331   :  { %v453_v14 = vpop.xlane.xlu2 %452  ;;  %v584_v52 = vsel %vm226_vm8, %v583_v6, %v975_v7  ;;  %v585_v21 = vrot.slane %v975_v7, 4  ;;  %v574_v25 = vsel %vm226_vm8, %v965_v55, %v573_v12 }
 0x332   :  { %v499_v15 = vsub.f32 %v1287_v8, %v453_v14  ;;  %v590_v17 = vperm.slane %v584_v52, %v1159_v61  ;;  %v621_v24 = vrot.slane %v578_v38, 4  ;;  %v582_v39 = vperm.slane %v574_v25, %v1159_v61 }
 0x333   :  { %v483_v16 = vpop.xlane.xlu0 %482  ;;  %v586_v35 = vsel %vm226_vm8, %v967_v60, %v585_v21 }
 0x334   :  { %v515_v23 = vmul.f32 1.442695, %v499_v15  ;;  %v509_v58 = vsub.f32 %v1293_v13, %v483_v16  ;;  %v619_v32 = vrot.slane %v590_v17, 4  ;;  %v977_v34 = vpop.eup %976  ;;  %v622_v37 = vsel %vm226_vm8, %v590_v17, %v621_v24 }
 0x335   :  { %v495_v8 = vpop.xlane.xlu1 %494  ;;  %v594_v44 = vperm.slane %v586_v35, %v1159_v61  ;;  %v547_v45 = vrot.slane %v977_v34, 4  ;;  %v1359_v48 = vperm.slane %v622_v37, %v1173_v19  ;;  %v633_v57 = vrot.slane %v582_v39, 4 }
 0x336   :  { %978 = vpow2.f32 %v515_v23  ;;  %v535_v13 = vmul.f32 1.442695, %v509_v58  ;;  %v513_v40 = vsub.f32 %v1304_v11, %v495_v8  ;;  %v620_v49 = vsel %vm226_vm8, %v619_v32, %v578_v38 }
 0x337   :  { %980 = vpow2.f32 %v537_v28  ;;  %v595_v11 = vrot.slane %v566_v36, 4  ;;  %v626_v22 = vperm.slane %v620_v49, %v1173_v19  ;;  %v631_v26 = vrot.slane %v594_v44, 4 }
 0x338   :  { %982 = vpow2.f32 %v545_v1  ;;  %v634_v10 = vsel %vm226_vm8, %v594_v44, %v633_v57 }
 0x339   :  { %v480_v41 = vpop.xlane.xlu2 %479  ;;  %984 = vpow2.f32 %v535_v13  ;;  %v643_v47 = vrot.slane %v626_v22, 4  ;;  %v632_v16 = vsel %vm226_vm8, %v631_v26, %v582_v39  ;;  %v1389_v58 = vperm.slane %v634_v10, %v1173_v19 }
 0x33a   :  { %v508_v42 = vsub.f32 %v1310_v5, %v480_v41  ;;  %v543_v5 = vmul.f32 1.442695, %v513_v40  ;;  %v638_v32 = vperm.slane %v632_v16, %v1173_v19 }
 0x33b   :  { %v492_v46 = vpop.xlane.xlu0 %491 }
 0x33c   :  { %v979_v50 = vpop.eup %978  ;;  %v533_v51 = vmul.f32 1.442695, %v508_v42  ;;  %v512_v3 = vsub.f32 %v1313_v27, %v492_v46  ;;  %v647_v27 = vrot.slane %v1359_v48, 4 }
 0x33d   :  { %v549_v18 = vrot.slane %v979_v50, 4  ;;  %v548_v54 = vsel %vm226_vm8, %v547_v45, %v979_v50  ;;  %v477_v56 = vpop.xlane.xlu1 %476  ;;  %v1366_v59 = vpop.eup %980  ;;  %v655_v45 = vrot.slane %v1389_v58, 4 }
 0x33e   :  { %986 = vpow2.f32 %v533_v51  ;;  %v541_v55 = vmul.f32 1.442695, %v512_v3  ;;  %v554_v60 = vperm.slane %v548_v54, %v1159_v61  ;;  %v507_v62 = vsub.f32 %v1320_v31, %v477_v56  ;;  %v983_v0 = vpop.eup %982 }
 0x33f   :  { %v550_v63 = vsel %vm226_vm8, %v977_v34, %v549_v18  ;;  %v1378_v53 = vpop.eup %984  ;;  %v671_v1 = vrot.slane %v1366_v59, 4  ;;  %v695_v8 = vrot.slane %v983_v0, 4 }
 0x340   :  { %988 = vpow2.f32 %v541_v55  ;;  %v597_v2 = vrot.slane %v554_v60, 4  ;;  %v596_v4 = vsel %vm226_vm8, %v595_v11, %v554_v60  ;;  %v558_v6 = vperm.slane %v550_v63, %v1159_v61 }
 0x341   :  { %990 = vpow2.f32 %v543_v5  ;;  %v531_v38 = vmul.f32 1.442695, %v507_v62  ;;  %v489_v7 = vpop.xlane.xlu2 %488  ;;  %v602_v9 = vperm.slane %v596_v4, %v1173_v19  ;;  %v659_v35 = vrot.slane %v1378_v53, 4 }
 0x342   :  { %v511_v31 = vsub.f32 %v1325_v33, %v489_v7  ;;  %v598_v12 = vsel %vm226_vm8, %v566_v36, %v597_v2  ;;  %v608_v14 = vsel %vm226_vm8, %v607_v43, %v558_v6  ;;  %v609_v23 = vrot.slane %v558_v6, 4 }
 0x343   :  { %992 = vpow2.f32 %v531_v38  ;;  %v606_v15 = vperm.slane %v598_v12, %v1173_v19  ;;  %v645_v52 = vrot.slane %v602_v9, 4  ;;  %v614_v21 = vperm.slane %v608_v14, %v1173_v19 }
 0x344   :  { %v987_v17 = vpop.eup %986  ;;  %v539_v20 = vmul.f32 1.442695, %v511_v31  ;;  %v1384_v33 = vsel %vm226_vm8, %v643_v47, %v602_v9  ;;  %v610_v40 = vsel %vm226_vm8, %v1348_v30, %v609_v23 }
 0x345   :  { %v648_v24 = vsel %vm226_vm8, %v647_v27, %v606_v15  ;;  %v646_v25 = vsel %vm226_vm8, %v626_v22, %v645_v52  ;;  %v649_v28 = vrot.slane %v606_v15, 4  ;;  %v673_v36 = vrot.slane %v987_v17, 4 }
 0x346   :  { %v989_v29 = vpop.eup %988  ;;  %994 = vpow2.f32 %v539_v20  ;;  %781 = vrot.lane.b32.xlu0 %v648_v24, %s1035_s14  ;;  %773 = vrot.lane.b32.xlu2 %v646_v25, %s1036_s15  ;;  %v653_v13 = vrot.slane %v614_v21, 4  ;;  %v672_v41 = vsel %vm226_vm8, %v671_v1, %v987_v17  ;;  %v618_v30 = vperm.slane %v610_v40, %v1173_v19 }
 0x347   :  { %v991_v34 = vpop.eup %990  ;;  %v697_v37 = vrot.slane %v989_v29, 4  ;;  %v650_v39 = vsel %vm226_vm8, %v1359_v48, %v649_v28  ;;  %v696_v42 = vsel %vm226_vm8, %v695_v8, %v989_v29  ;;  %v678_v46 = vperm.slane %v672_v41, %v1159_v61 }
 0x348   :  { %789 = vrot.lane.b32.xlu1 %v650_v39, %s1037_s16  ;;  %v683_v49 = vrot.slane %v991_v34, 4  ;;  %v651_v48 = vrot.slane %v638_v32, 4  ;;  %v702_v51 = vperm.slane %v696_v42, %v1159_v61  ;;  %v674_v5 = vsel %vm226_vm8, %v1366_v59, %v673_v36 }
 0x349   :  { %v993_v43 = vpop.eup %992  ;;  %v698_v44 = vsel %vm226_vm8, %v983_v0, %v697_v37  ;;  %v707_v57 = vrot.slane %v678_v46, 4  ;;  %v654_v56 = vsel %vm226_vm8, %v638_v32, %v653_v13  ;;  %v656_v0 = vsel %vm226_vm8, %v655_v45, %v618_v30 }
 0x34a   :  { %v660_v50 = vsel %vm226_vm8, %v659_v35, %v993_v43  ;;  %v661_v3 = vrot.slane %v993_v43, 4  ;;  %v706_v54 = vperm.slane %v698_v44, %v1159_v61  ;;  %v652_v55 = vsel %vm226_vm8, %v651_v48, %v614_v21  ;;  %v849_v48 = vld [vmem:[%s1495_s1 + $0xb8] sm:$0xff] }
 0x34b   :  { %v666_v11 = vperm.slane %v660_v50, %v1159_v61  ;;  %v731_v63 = vrot.slane %v702_v51, 4  ;;  %v657_v6 = vrot.slane %v618_v30, 4  ;;  %v682_v9 = vperm.slane %v674_v5, %v1159_v61  ;;  %v848_v50 = vld [vmem:[%s1495_s1 + $0xb0] sm:$0xff]  ;;  %869 = vmatpush.msrb.mxu0 %v849_v48 }
 0x34c   :  { %v995_v18 = vpop.eup %994  ;;  %v662_v4 = vsel %vm226_vm8, %v1378_v53, %v661_v3  ;;  %v743_v47 = vrot.slane %v706_v54, 4 }
 0x34d   :  { %v685_v60 = vrot.slane %v995_v18, 4  ;;  %v684_v22 = vsel %vm226_vm8, %v683_v49, %v995_v18  ;;  %v708_v62 = vsel %vm226_vm8, %v707_v57, %v666_v11  ;;  %v709_v27 = vrot.slane %v666_v11, 4  ;;  %870 = vmatpush.msrb.mxu0 %v848_v50 }
 0x34e   :  { %797 = vrot.lane.b32.xlu0 %v652_v55, %s1038_s17  ;;  %805 = vrot.lane.b32.xlu2 %v654_v56, %s1039_s18  ;;  %v690_v59 = vperm.slane %v684_v22, %v1159_v61  ;;  %v714_v2 = vperm.slane %v708_v62, %v1173_v19  ;;  %v670_v53 = vperm.slane %v662_v4, %v1159_v61  ;;  %v719_v23 = vrot.slane %v682_v9, 4 }
 0x34f   :  { %v686_v26 = vsel %vm226_vm8, %v991_v34, %v685_v60  ;;  %v710_v31 = vsel %vm226_vm8, %v678_v46, %v709_v27  ;;  %v658_v20 = vsel %vm226_vm8, %v1389_v58, %v657_v6 }
 0x350   :  { %813 = vrot.lane.b32.xlu1 %v656_v0, %s1040_s19  ;;  %v732_v38 = vsel %vm226_vm8, %v731_v63, %v690_v59  ;;  %v733_v7 = vrot.slane %v690_v59, 4  ;;  %v694_v12 = vperm.slane %v686_v26, %v1159_v61  ;;  %v757_v15 = vrot.slane %v714_v2, 4 }
 0x351   :  { %v738_v10 = vperm.slane %v732_v38, %v1173_v19  ;;  %v718_v21 = vperm.slane %v710_v31, %v1173_v19  ;;  %v720_v61 = vsel %vm226_vm8, %v719_v23, %v670_v53  ;;  %v721_v58 = vrot.slane %v670_v53, 4 }
 0x352   :  { %v734_v14 = vsel %vm226_vm8, %v702_v51, %v733_v7  ;;  %v744_v17 = vsel %vm226_vm8, %v743_v47, %v694_v12  ;;  %v745_v1 = vrot.slane %v694_v12, 4  ;;  %v726_v32 = vperm.slane %v720_v61, %v1173_v19  ;;  %v846_v51 = vld [vmem:[%s1495_s1 + $0xa0] sm:$0xff] }
 0x353   :  { %v755_v52 = vrot.slane %v738_v10, 4  ;;  %v742_v16 = vperm.slane %v734_v14, %v1173_v19  ;;  %v758_v24 = vsel %vm226_vm8, %v738_v10, %v757_v15  ;;  %v750_v28 = vperm.slane %v744_v17, %v1173_v19 }
 0x354   :  { %v746_v35 = vsel %vm226_vm8, %v706_v54, %v745_v1  ;;  %v761_v36 = vrot.slane %v718_v21, 4  ;;  %v722_v37 = vsel %vm226_vm8, %v682_v9, %v721_v58  ;;  %v765_v40 = vrot.slane %v726_v32, 4 }
 0x355   :  { %v759_v25 = vrot.slane %v742_v16, 4  ;;  %v756_v29 = vsel %vm226_vm8, %v755_v52, %v714_v2  ;;  %v763_v34 = vrot.slane %v750_v28, 4  ;;  %v754_v41 = vperm.slane %v746_v35, %v1173_v19 }
 0x356   :  { %821 = vrot.lane.b32.xlu0 %v658_v20, %s1041_s20  ;;  %775 = vrot.lane.b32.xlu2 %v758_v24, %s1036_s15  ;;  %v762_v39 = vsel %vm226_vm8, %v742_v16, %v761_v36  ;;  %v766_v42 = vsel %vm226_vm8, %v750_v28, %v765_v40  ;;  %v730_v43 = vperm.slane %v722_v37, %v1173_v19  ;;  %v847_v19 = vld [vmem:[%s1495_s1 + $0xa8] sm:$0xff] }
 0x357   :  { %v760_v8 = vsel %vm226_vm8, %v759_v25, %v718_v21  ;;  %v764_v13 = vsel %vm226_vm8, %v763_v34, %v726_v32  ;;  %v767_v44 = vrot.slane %v754_v41, 4  ;;  %871 = vmatpush.msrb.mxu0 %v847_v19 }
 0x358   :  { %783 = vrot.lane.b32.xlu1 %v760_v8, %s1035_s14  ;;  %v769_v45 = vrot.slane %v730_v43, 4 }
 0x359   :  { %v768_v46 = vsel %vm226_vm8, %v767_v44, %v730_v43  ;;  %872 = vmatpush.msrb.mxu0 %v846_v51 }
 0x35a   :  { %v770_v49 = vsel %vm226_vm8, %v754_v41, %v769_v45 }
 0x35e   :  { %791 = vrot.lane.b32.xlu0 %v762_v39, %s1037_s16  ;;  %799 = vrot.lane.b32.xlu2 %v764_v13, %s1038_s17 }
 0x360   :  { %807 = vrot.lane.b32.xlu1 %v766_v42, %s1039_s18 }
 0x366   :  { %815 = vrot.lane.b32.xlu0 %v768_v46, %s1040_s19  ;;  %823 = vrot.lane.b32.xlu2 %v770_v49, %s1041_s20 }
 0x3a0   :  { %v774_v3 = vpop.permute.xlu2 %773 }
 0x3a1   :  { %v827_v18 = vsel %vm450_vm9, %v1384_v33, %v774_v3 }
 0x3a8   :  { %v806_v57 = vpop.permute.xlu2 %805 }
 0x3b0   :  { %v776_v22 = vpop.permute.xlu2 %775 }
 0x3b1   :  { %v828_v0 = vsel %vm450_vm9, %v756_v29, %v776_v22 }
 0x3b8   :  { %v782_v30 = vpop.permute.xlu0 %781  ;;  %v800_v26 = vpop.permute.xlu2 %799 }
 0x3b9   :  { %v830_v5 = vsel %vm829_vm10, %v827_v18, %v782_v30 }
 0x3ba   :  { %v790_v11 = vpop.permute.xlu1 %789 }
 0x3bb   :  { %v833_v55 = vsel %vm832_vm11, %v830_v5, %v790_v11 }
 0x3c0   :  { %v798_v54 = vpop.permute.xlu0 %797  ;;  %v824_v31 = vpop.permute.xlu2 %823 }
 0x3c1   :  { %v835_v56 = vsel %vm21_vm0, %v833_v55, %v798_v54 }
 0x3c2   :  { %v814_v60 = vpop.permute.xlu1 %813  ;;  %v838_v62 = vsel %vm837_vm12, %v835_v56, %v806_v57 }
 0x3c3   :  { %v841_v27 = vsel %vm840_vm13, %v838_v62, %v814_v60 }
 0x3c8   :  { %v822_v59 = vpop.permute.xlu0 %821 }
 0x3c9   :  { %v844_v33 = vsel %vm843_vm14, %v841_v27, %v822_v59 }
 0x3ca   :  { %938 = vmatmul.msk.f32.vlgmr.msrb.gmra.mxu0 %vm850_vm15, %v844_v33  ;;  %v784_v63 = vpop.permute.xlu1 %783 }
 0x3cb   :  { %v831_v4 = vsel %vm829_vm10, %v828_v0, %v784_v63 }
 0x3d0   :  { %v792_v2 = vpop.permute.xlu0 %791 }
 0x3d1   :  { %v834_v6 = vsel %vm832_vm11, %v831_v4, %v792_v2 }
 0x3d2   :  { %v808_v38 = vpop.permute.xlu1 %807  ;;  %v836_v7 = vsel %vm21_vm0, %v834_v6, %v800_v26 }
 0x3d3   :  { %v839_v9 = vsel %vm837_vm12, %v836_v7, %v808_v38 }
 0x3d8   :  { %v816_v10 = vpop.permute.xlu0 %815 }
 0x3d9   :  { %v842_v12 = vsel %vm840_vm13, %v839_v9, %v816_v10 }
 0x3da   :  { %v845_v47 = vsel %vm843_vm14, %v842_v12, %v824_v31 }
 0x3db   :  { %939 = vmatmul.msk.f32.gmra.mxu0 %vm850_vm15, %v845_v47 }
 0x447   :  { %v874_v14 = vpop.f32.mrf.mxu0 }
 0x448   :  { %996 = vrcp.f32 %v874_v14  ;;  %v891_v16 = vand.u32 2147483648, %v874_v14  ;;  %v889_v20 = vand.u32 2147483647, %v874_v14  ;;  %vm885_vm0 = vweird.f32 %v874_v14 }
 0x44a   :  { %v892_v23 = vor.u32 1.1754944e-38, %v891_v16  ;;  %vm890_vm3 = vcmp.eq.f32.partialorder %v889_v20, 8.507059e+37 }
 0x44e   :  { %v997_v53 = vpop.eup %996 }
 0x44f   :  { %v881_v15 = vmul.f32 %v997_v53, %v874_v14  ;;  %vm886_vm1 = vweird.f32 %v997_v53 }
 0x450   :  { %vm887_vm2 = vmor %vm885_vm0, %vm886_vm1 }
 0x451   :  { %v882_v52 = vsub.f32 1.0, %v881_v15 }
 0x453   :  { %v883_v17 = vmul.f32 %v997_v53, %v882_v52 }
 0x455   :  { %v884_v21 = vadd.f32 %v997_v53, %v883_v17 }
 0x457   :  { %v888_v24 = vsel %vm887_vm2, %v997_v53, %v884_v21 }
 0x458   :  { %v893_v25 = vsel %vm890_vm3, %v892_v23, %v888_v24  ;;  %v877_v28 = vpop.f32.mrf.mxu0 }
 0x459   :  { %v894_v29 = vmul.f32 %v893_v25, %v844_v33  ;;  %998 = vrcp.f32 %v877_v28  ;;  %v906_v58 = vand.u32 2147483648, %v877_v28  ;;  %v904_v34 = vand.u32 2147483647, %v877_v28 }
 0x45a   :  { %vm900_vm5 = vweird.f32 %v877_v28 }
 0x45b   :  { %910 = vst.msk [vmem:[#allocation2] sm:$0xff] %vm850_vm15, %v894_v29  ;;  %v907_v36 = vor.u32 1.1754944e-38, %v906_v58  ;;  %vm905_vm7 = vcmp.eq.f32.partialorder %v904_v34, 8.507059e+37 }
 0x45f   :  { %v999_v61 = vpop.eup %998 }
 0x460   :  { %v896_v1 = vmul.f32 %v999_v61, %v877_v28  ;;  %vm901_vm4 = vweird.f32 %v999_v61 }
 0x461   :  { %vm902_vm6 = vmor %vm900_vm5, %vm901_vm4 }
 0x462   :  { %v897_v8 = vsub.f32 1.0, %v896_v1 }
 0x464   :  { %v898_v32 = vmul.f32 %v999_v61, %v897_v8 }
 0x466   :  { %v899_v35 = vadd.f32 %v999_v61, %v898_v32 }
 0x468   :  { %v903_v37 = vsel %vm902_vm6, %v999_v61, %v899_v35 }
 0x469   :  { %v908_v39 = vsel %vm905_vm7, %v907_v36, %v903_v37 }
 0x46a   :  { %v909_v13 = vmul.f32 %v908_v39, %v845_v47 }
 0x46c   :  { %911 = vst.msk [vmem:[#allocation2 + $0x8] sm:$0xff] %vm850_vm15, %v909_v13 }
 0x46d   :  { %924 = dma.vmem_to_hbm [thread:$0]  %s917_s4, 256, %s919_s29, [#allocation3], %s1043_s5, %s1043_s5, %s1035_s14  }
 0x46e   :  { %1024 = dma.done.wait [#allocation3], 256  }
 0x46f   :  { %1025 = vsyncadd [#allocation3], 4294967040 }
 0x470   :  { %929 = vsyncpa [#allocation3], 1 }

</bundles_post_ra>
